<compile_context>
chip_gen: v6e
topology: v6e:2x2x1
jax: 0.10.0
libtpu: 0.0.40
codegen_flags: <defaults>
</compile_context>

<pallas_src>
import functools

import jax
import jax.numpy as jnp
from jax.experimental import pallas as pl
from jax.experimental.pallas import tpu as pltpu

_LANE = 128
_MAX_BLOCK_COLS = 8192


def _activation_kernel(x_ref, o_ref, *, option: str):
    x = x_ref[...]
    if option == "sin":
        o_ref[...] = jnp.sin(x)
    elif option == "relu":
        # Scalar constant: no per-step zeros-block broadcast.
        o_ref[...] = jnp.maximum(x, 0.0)
    else:
        raise ValueError(f"unknown activation option: {option}")


def _sublane_min(dtype) -> int:
    """Minimum second-to-last block dim for full-rate (8,128) vreg packing."""
    nbytes = jnp.dtype(dtype).itemsize
    if nbytes >= 4:
        return 8
    return 32 // nbytes  # 16 for bf16/f16, 32 for int8/fp8


def _vmem_capacity_bytes() -> int:
    try:
        return int(pltpu.get_tpu_info().vmem_capacity_bytes)
    except Exception:
        return 64 * 1024 * 1024  # conservative fallback (v7x per-TC VMEM)


def _pick_tiles(R: int, C: int, dtype):
    """Choose (block_rows, block_cols, vmem_cap).

    C is always a multiple of 128 here (see _prepare_lane_dense). Blocks fill
    the generation-appropriate budget, but the grid keeps >= 8 steps for arrays
    larger than ~2 MiB (pipelining + dual-TC sharding on v7x)."""
    nbytes = jnp.dtype(dtype).itemsize
    smin = _sublane_min(dtype)
    vmem_cap = _vmem_capacity_bytes()

    if vmem_cap >= 96 * 1024 * 1024:
        # v5e / v6e: 128 MiB VMEM -> ~16 MiB blocks amortize per-step overhead.
        block_budget = vmem_cap // 8
    else:
        # v7x: 64 MiB VMEM -> keep 4 MiB blocks so 2 in + 2 out bufs fit easily.
        block_budget = min(4 * 1024 * 1024, vmem_cap // 16)

    # Lane-dense column tile (multiple of 128, or full extent).
    max_cols_by_budget = max(
        _LANE, ((block_budget // (smin * nbytes)) // _LANE) * _LANE
    )
    block_cols = min(C, _MAX_BLOCK_COLS, max_cols_by_budget)

    rows_by_budget = max(
        smin, ((block_budget // max(1, block_cols * nbytes)) // smin) * smin
    )
    block_rows = min(R, rows_by_budget)  # full extent (==R) is always legal

    # Keep >= 8 grid steps for anything over ~2 MiB so DMA-in / compute / DMA-out
    # overlap and v7x can shard the grid across its 2 TensorCores.
    total_bytes = R * C * nbytes
    min_steps = 8 if total_bytes > 2 * 1024 * 1024 else 1
    col_steps = pl.cdiv(C, block_cols)
    if min_steps > 1:
        row_steps_needed = pl.cdiv(min_steps, col_steps)
        if pl.cdiv(R, block_rows) < row_steps_needed:
            target_rows = pl.cdiv(R, row_steps_needed)
            block_rows = max(smin, (target_rows // smin) * smin)

    return block_rows, block_cols, vmem_cap


def _prepare_lane_dense(x):
    """Return (x2d, pad_elems). x2d always has a last dim that is a multiple of
    128 (or is the full, unpadded last dim when it already is), so stores are
    unmasked full-rate `vst` instead of per-row masked partial stores."""
    if x.ndim >= 2 and x.shape[-1] % _LANE == 0:
        return x.reshape(-1, x.shape[-1]), 0

    flat = x.reshape(-1)
    n = flat.shape[0]
    if n <= _LANE:
        width = _LANE
    else:
        width = min(_MAX_BLOCK_COLS, (n // _LANE) * _LANE)
    rows = pl.cdiv(n, width)
    padded = rows * width
    pad = padded - n
    if pad:
        flat = jnp.pad(flat, (0, pad))
    return flat.reshape(rows, width), pad


def activation_function(x, option: str):
    """Elementwise sin / relu via a Pallas TPU kernel (matches the PyTorch module)."""
    if option not in ("sin", "relu"):
        # TODO(synk): PyTorch returns None for an unknown option; we raise instead.
        raise ValueError(f"unknown activation option: {option}")

    if x.size == 0:
        return jnp.sin(x) if option == "sin" else jnp.maximum(x, 0.0)

    orig_shape = x.shape
    n_valid = x.size
    x2, pad = _prepare_lane_dense(x)
    R, C = x2.shape

    block_rows, block_cols, vmem_cap = _pick_tiles(R, C, x2.dtype)
    grid = (pl.cdiv(R, block_rows), pl.cdiv(C, block_cols))

    nbytes = jnp.dtype(x2.dtype).itemsize
    block_bytes = block_rows * block_cols * nbytes
    # 2 in-bufs + 2 out-bufs double-buffered, plus headroom; never exceed 3/4 of
    # physical VMEM (v7x has only 64 MiB per TensorCore).
    vmem_limit = int(
        min(vmem_cap * 3 // 4, max(32 * 1024 * 1024, 6 * block_bytes))
    )

    kernel = functools.partial(_activation_kernel, option=option)

    out = pl.pallas_call(
        kernel,
        out_shape=jax.ShapeDtypeStruct((R, C), x2.dtype),
        grid_spec=pltpu.PrefetchScalarGridSpec(
            num_scalar_prefetch=0,
            grid=grid,
            in_specs=[pl.BlockSpec((block_rows, block_cols), lambda i, j: (i, j))],
            out_specs=pl.BlockSpec((block_rows, block_cols), lambda i, j: (i, j)),
        ),
        compiler_params=pltpu.CompilerParams(
            dimension_semantics=("parallel", "parallel"),
            vmem_limit_bytes=vmem_limit,
        ),
        cost_estimate=pl.CostEstimate(
            flops=R * C,
            transcendentals=(R * C if option == "sin" else 0),
            bytes_accessed=2 * R * C * nbytes,
        ),
    )(x2)

    if pad:
        out = out.reshape(-1)[:n_valid]
    return out.reshape(orig_shape)


if __name__ == "__main__":
    key = jax.random.PRNGKey(0)
    k0, k1, k2 = jax.random.split(key, 3)

    # FBSNN hidden-layer activation shape: [batch, hidden].
    x = jax.random.normal(k0, (16, 256), dtype=jnp.float32)
    y_sin = activation_function(x, "sin")
    y_relu = activation_function(x, "relu")
    jax.block_until_ready(y_sin)
    jax.block_until_ready(y_relu)
    assert jnp.allclose(y_sin, jnp.sin(x), atol=1e-6)
    assert jnp.allclose(y_relu, jnp.maximum(x, 0.0), atol=1e-6)

    # bf16 stays 16-bit end-to-end (halved HBM traffic / packed VALU work).
    xb = jax.random.normal(k1, (8, 384), dtype=jnp.bfloat16)
    yb = activation_function(xb, "relu")
    jax.block_until_ready(yb)
    assert jnp.array_equal(yb, jnp.maximum(xb, jnp.bfloat16(0)))

    # Non-128-aligned last dim + >2-D input -> lane-dense flatten/pad path.
    xo = jax.random.normal(k2, (3, 5, 100), dtype=jnp.float32)
    yo = activation_function(xo, "sin")
    jax.block_until_ready(yo)
    assert yo.shape == xo.shape
    assert jnp.allclose(yo, jnp.sin(xo), atol=1e-6)

    print("KERNEL_OK")
</pallas_src>

<mosaic_0001>
module attributes {stable_mosaic.version = 11 : i64} {
  func.func @_activation_kernel(%arg0: i32, %arg1: i32, %arg2: memref<16x256xf32, #tpu.memory_space<vmem>>, %arg3: memref<16x256xf32, #tpu.memory_space<vmem>>) attributes {dimension_semantics = [#tpu.dimension_semantics<parallel>, #tpu.dimension_semantics<parallel>], iteration_bounds = array<i64: 1, 1>, scalar_prefetch = 0 : i64, scratch_operands = 0 : i64, tpu.core_type = #tpu.core_type<tc>, window_params = [{transform_indices = @transform_0, window_bounds = array<i64: 16, 256>}, {transform_indices = @transform_1, window_bounds = array<i64: 16, 256>}]} {
    %c0 = arith.constant 0 : index
    %c0_0 = arith.constant 0 : index
    %0 = vector.load %arg2[%c0, %c0_0] : memref<16x256xf32, #tpu.memory_space<vmem>>, vector<16x256xf32>
    %1 = math.sin %0 : vector<16x256xf32>
    %c0_1 = arith.constant 0 : index
    %c0_2 = arith.constant 0 : index
    %2 = vector.load %arg3[%c0_1, %c0_2] : memref<16x256xf32, #tpu.memory_space<vmem>>, vector<16x256xf32>
    tpu.vector_store %arg3[%c0_1, %c0_2], %1 {strides = array<i32>} : memref<16x256xf32, #tpu.memory_space<vmem>>, vector<16x256xf32>,
    return
  }
  func.func @transform_0(%arg0: i32, %arg1: i32) -> (i32, i32) {
    %c0_i32 = arith.constant 0 : i32
    return %arg0, %arg1 : i32, i32
  }
  func.func @transform_1(%arg0: i32, %arg1: i32) -> (i32, i32) {
    %c0_i32 = arith.constant 0 : i32
    return %arg0, %arg1 : i32, i32
  }
}

</mosaic_0001>

<bundles_post_ra>
// kernel: tpu_custom_call.1
= control target key start
LH: loop header
LB: loop body
LE: loop exit
PB: predicated region body
PF: predicated region fallthrough
CT: control target
= control target key end

     0   :  { %6 = vsyncpa [#allocation3], 0  ;;  %s892_s0 = inlined_call_operand.hbm [shape: f32[16,256], index: 0, kind: input, shape index: {}]   ;;  %s893_s1 = inlined_call_operand.hbm [shape: f32[16,256], index: 1, kind: output, shape index: {}]  }
   0x1   :  { %7 = vsyncpa [#allocation4], 0  ;;  %s566_s6 = smov [#allocation2]  }
   0x2   :  { %s13_s7 = sshll.u32 %s566_s6, 4  ;;  %s14_s7 = int_to_ptr.vmem [resolvable:$true] %s13_s7 }
   0x3   :  { %s530_s8 = scalar_lea.vmem %s14_s7, 512  ;;  %p535_p1 = scmp.lt.s32.totalorder %s14_s7, %s14_s7 }
   0x4   :  { %p531_p0 = scmp.ne.s32.totalorder %s14_s7, %s530_s8  ;;  %p536_p2 = scmp.lt.s32.totalorder %s530_s8, %s530_s8 }
   0x6   :  { %p537_p3 = por %p536_p2, %p535_p1 }
   0x8   :  { %p538_p4 = pnand %p537_p3, %p531_p0 }
   0xa   :  { %541 = shalt.err (!%p538_p4)
}
   0xb   :  { %s567_s9 = smov 256   ;;  %s568_s10 = smov 16  }
   0xc   :  { %19 = dma.hbm_to_vmem [thread:$0]  %s892_s0, 512, %s14_s7, [#allocation3], %s567_s9, %s567_s9, %s568_s10  }
   0xd   :  { %562 = dma.done.wait [#allocation3], 512  }
   0xe   :  { %563 = vsyncadd [#allocation3], 4294966784  ;;  %v592_v0 = vld [vmem:[#allocation2] sm:$0xff]  ;;  %v594_v1 = vld [vmem:[#allocation2 + $0x8] sm:$0xff]  ;;  %v569_v30 = vmov 683565275  }
   0xf   :  { %v596_v2 = vld [vmem:[#allocation2 + $0x10] sm:$0xff]  ;;  %v27_v3 = vand.u32 2147483647, %v592_v0  ;;  %v30_v4 = vand.u32 2139095040, %v592_v0  ;;  %v131_v5 = vand.u32 2147483647, %v594_v1 }
  0x10   :  { %v134_v6 = vand.u32 2139095040, %v594_v1  ;;  %v238_v11 = vand.u32 2139095040, %v596_v2  ;;  %v235_v24 = vand.u32 2147483647, %v596_v2  ;;  %v570_v32 = vmov 2475754826  }
  0x11   :  { %v31_v7 = vshrl.u32 %v30_v4, 23  ;;  %v34_v8 = vand.u32 8388607, %v27_v3  ;;  %v138_v10 = vand.u32 8388607, %v131_v5  ;;  %vm29_vm14 = vcmp.lt.s32.totalorder %v592_v0, 0 }
  0x12   :  { %v135_v9 = vshrl.u32 %v134_v6, 23  ;;  %v239_v14 = vshrl.u32 %v238_v11, 23  ;;  %v571_v34 = vmov 2131351028   ;;  %v572_v36 = vmov 2102212464  }
  0x13   :  { %v464_v12 = vadd.s32 4294967169, %v31_v7  ;;  %v35_v16 = vor.u32 8388608, %v34_v8  ;;  %v139_v17 = vor.u32 8388608, %v138_v10  ;;  %v573_v38 = vmov 920167782   ;;  %s575_s0 = smov [#allocation5]  }
  0x14   :  { %v468_v13 = vadd.s32 4294967169, %v135_v9  ;;  %v472_v19 = vadd.s32 4294967169, %v239_v14  ;;  %v574_v46 = vmov 1326507024   ;;  %s452_s13 = sshll.u32 %s575_s0, 4  ;;  %s453_s13 = int_to_ptr.vmem [resolvable:$true] %s452_s13 }
  0x15   :  { %v37_v15 = vadd.s32 1, %v464_v12  ;;  %v608_v25 = vshll.u32 %v35_v16, 8  ;;  %v610_v27 = vshll.u32 %v139_v17, 8  ;;  %s542_s14 = scalar_lea.vmem %s453_s13, 512  ;;  %p547_p6 = scmp.lt.s32.totalorder %s453_s13, %s453_s13 }
  0x16   :  { %v141_v18 = vadd.s32 1, %v468_v13  ;;  %v612_v28 = vadd.s32 1, %v472_v19  ;;  %p543_p5 = scmp.ne.s32.totalorder %s453_s13, %s542_s14  ;;  %p548_p7 = scmp.lt.s32.totalorder %s542_s14, %s542_s14 }
  0x17   :  { %vm38_vm0 = vcmp.gt.s32.totalorder %v37_v15, 0 }
  0x18   :  { %v39_v20 = vsel %vm38_vm0, %v37_v15, 0  ;;  %vm142_vm1 = vcmp.gt.s32.totalorder %v141_v18, 0  ;;  %vm246_vm6 = vcmp.gt.s32.totalorder %v612_v28, 0  ;;  %p549_p8 = por %p548_p7, %p547_p6 }
  0x19   :  { %v40_v21 = vshrl.u32 %v39_v20, 5  ;;  %v41_v22 = vand.u32 31, %v39_v20  ;;  %v143_v23 = vsel %vm142_vm1, %v141_v18, 0 }
  0x1a   :  { %v145_v26 = vand.u32 31, %v143_v23  ;;  %v619_v40 = vshrl.u32 %v143_v23, 5  ;;  %p550_p9 = pnand %p549_p8, %p543_p5 }
  0x1b   :  { %v42_v29 = vsub.s32 32, %v41_v22  ;;  %v44_v31 = vshll.u32 %v569_v30, %v41_v22  ;;  %v47_v33 = vshll.u32 %v570_v32, %v41_v22  ;;  %v50_v35 = vshll.u32 %v571_v34, %v41_v22 }
  0x1c   :  { %v53_v37 = vshll.u32 %v572_v36, %v41_v22  ;;  %v56_v39 = vshll.u32 %v573_v38, %v41_v22  ;;  %vm59_vm2 = vcmp.lt.s32.totalorder %v40_v21, 1  ;;  %vm60_vm3 = vcmp.lt.s32.totalorder %v40_v21, 2 }
  0x1d   :  { %v43_v41 = vshrl.u32 %v569_v30, %v42_v29  ;;  %v45_v42 = vshrl.u32 %v570_v32, %v42_v29  ;;  %v48_v43 = vshrl.u32 %v571_v34, %v42_v29  ;;  %v51_v44 = vshrl.u32 %v572_v36, %v42_v29 }
  0x1e   :  { %v54_v45 = vshrl.u32 %v573_v38, %v42_v29  ;;  %v57_v47 = vshrl.u32 %v574_v46, %v42_v29  ;;  %vm62_vm4 = vcmp.lt.s32.totalorder %v40_v21, 4  ;;  %v146_v51 = vsub.s32 32, %v145_v26 }
  0x1f   :  { %v46_v48 = vor.u32 %v45_v42, %v44_v31  ;;  %v49_v49 = vor.u32 %v48_v43, %v47_v33  ;;  %v52_v50 = vor.u32 %v51_v44, %v50_v35  ;;  %vm61_vm5 = vcmp.lt.s32.totalorder %v40_v21, 3 }
  0x20   :  { %v55_v52 = vor.u32 %v54_v45, %v53_v37  ;;  %v58_v53 = vor.u32 %v57_v47, %v56_v39  ;;  %v148_v54 = vshll.u32 %v569_v30, %v145_v26  ;;  %v151_v62 = vshll.u32 %v570_v32, %v145_v26 }
  0x21   :  { %v63_v55 = vsel %vm59_vm2, %v43_v41, %v46_v48  ;;  %v64_v56 = vsel %vm62_vm4, %v52_v50, 2102212464  ;;  %v67_v57 = vsel %vm59_vm2, %v46_v48, %v49_v49  ;;  %v71_v58 = vsel %vm59_vm2, %v49_v49, %v52_v50 }
  0x22   :  { %v65_v59 = vsel %vm61_vm5, %v49_v49, %v64_v56  ;;  %v68_v60 = vsel %vm62_vm4, %v55_v52, 920167782  ;;  %v72_v61 = vsel %vm62_vm4, %v58_v53, 1326507024  ;;  %v147_v6 = vshrl.u32 %v569_v30, %v146_v51 }
  0x23   :  { %v69_v63 = vsel %vm61_vm5, %v52_v50, %v68_v60  ;;  %v73_v4 = vsel %vm61_vm5, %v55_v52, %v72_v61  ;;  %v149_v7 = vshrl.u32 %v570_v32, %v146_v51  ;;  %v66_v8 = vsel %vm60_vm3, %v63_v55, %v65_v59  ;;  %v683_v60 = vld [vmem:[#allocation2 + $0x18] sm:$0xff] }
  0x24   :  { %v70_v9 = vsel %vm60_vm3, %v67_v57, %v69_v63  ;;  %v74_v10 = vsel %vm60_vm3, %v71_v58, %v73_v4  ;;  %v152_v11 = vshrl.u32 %v571_v34, %v146_v51  ;;  %v154_v18 = vshll.u32 %v571_v34, %v145_v26 }
  0x25   :  { %v640_v12 = vmul.u32.u64.low %v608_v25, %v74_v10  ;;  %v641_v13 = vmul.u32.u64.high %v608_v25, %v74_v10, %v640_v12  ;;  %v644_v14 = vmul.u32.u64.low %v608_v25, %v70_v9  ;;  %v645_v15 = vmul.u32.u64.high %v608_v25, %v70_v9, %v644_v14 }
  0x26   :  { %v150_v16 = vor.u32 %v149_v7, %v148_v54  ;;  %v153_v17 = vor.u32 %v152_v11, %v151_v62  ;;  %v155_v19 = vshrl.u32 %v572_v36, %v146_v51  ;;  %v157_v20 = vshll.u32 %v572_v36, %v145_v26 }
  0x27   :  { %v158_v21 = vshrl.u32 %v573_v38, %v146_v51  ;;  %v160_v22 = vshll.u32 %v573_v38, %v145_v26  ;;  %v161_v23 = vshrl.u32 %v574_v46, %v146_v51  ;;  %v82_v29 = vmul.u32 %v608_v25, %v66_v8 }
  0x28   :  { %v156_v31 = vor.u32 %v155_v19, %v154_v18  ;;  %vm163_vm7 = vcmp.lt.s32.totalorder %v619_v40, 1  ;;  %vm164_vm8 = vcmp.lt.s32.totalorder %v619_v40, 2  ;;  %vm84_vm9 = vc.u32 %v641_v13, %v644_v14 }
  0x29   :  { %v85_v33 = vadd.s32 1, %v645_v15  ;;  %v159_v35 = vor.u32 %v158_v21, %v157_v20  ;;  %vm165_vm10 = vcmp.lt.s32.totalorder %v619_v40, 3  ;;  %v162_v37 = vor.u32 %v161_v23, %v160_v22 }
  0x2a   :  { %vm166_vm11 = vcmp.lt.s32.totalorder %v619_v40, 4  ;;  %v167_v26 = vsel %vm163_vm7, %v147_v6, %v150_v16  ;;  %v171_v39 = vsel %vm163_vm7, %v150_v16, %v153_v17  ;;  %v175_v43 = vsel %vm163_vm7, %v153_v17, %v156_v31 }
  0x2b   :  { %v86_v25 = vsel %vm84_vm9, %v85_v33, %v645_v15  ;;  %v168_v41 = vsel %vm166_vm11, %v156_v31, 2102212464  ;;  %v172_v42 = vsel %vm166_vm11, %v159_v35, 920167782  ;;  %v176_v48 = vsel %vm166_vm11, %v162_v37, 1326507024 }
  0x2c   :  { %v87_v44 = vadd.s32 %v86_v25, %v82_v29  ;;  %v169_v45 = vsel %vm165_vm10, %v153_v17, %v168_v41  ;;  %v173_v47 = vsel %vm165_vm10, %v156_v31, %v172_v42  ;;  %v177_v51 = vsel %vm165_vm10, %v159_v35, %v176_v48 }
  0x2d   :  { %v170_v49 = vsel %vm164_vm8, %v167_v26, %v169_v45  ;;  %v174_v50 = vsel %vm164_vm8, %v171_v39, %v173_v47  ;;  %v247_v52 = vsel %vm246_vm6, %v612_v28, 0  ;;  %v178_v54 = vsel %vm164_vm8, %v175_v43, %v177_v51 }
  0x2e   :  { %v88_v53 = vadd.s32 536870912, %v87_v44  ;;  %v673_v55 = vmul.u32.u64.low %v610_v27, %v174_v50  ;;  %v674_v56 = vmul.u32.u64.high %v610_v27, %v174_v50, %v673_v55  ;;  %v242_v59 = vand.u32 8388607, %v235_v24 }
  0x2f   :  { %v678_v57 = vmul.u32.u64.low %v610_v27, %v178_v54  ;;  %v679_v58 = vmul.u32.u64.high %v610_v27, %v178_v54, %v678_v57  ;;  %v249_v28 = vand.u32 31, %v247_v52  ;;  %v186_v40 = vmul.u32 %v610_v27, %v170_v49 }
  0x30   :  { %v685_v61 = vshrl.u32 %v88_v53, 30  ;;  %v189_v63 = vadd.s32 1, %v674_v56  ;;  %v243_v6 = vor.u32 8388608, %v242_v59  ;;  %v342_v7 = vand.u32 2139095040, %v683_v60 }
  0x31   :  { %v250_v4 = vsub.s32 32, %v249_v28  ;;  %vm188_vm12 = vc.u32 %v679_v58, %v673_v55  ;;  %v696_v10 = vshrl.u32 %v247_v52, 5  ;;  %v339_v11 = vand.u32 2147483647, %v683_v60 }
  0x32   :  { %v90_v62 = vshll.u32 %v685_v61, 30  ;;  %v190_v9 = vsel %vm188_vm12, %v189_v63, %v674_v56  ;;  %v252_v12 = vshll.u32 %v569_v30, %v249_v28  ;;  %v255_v16 = vshll.u32 %v570_v32, %v249_v28 }
  0x33   :  { %v191_v27 = vadd.s32 %v190_v9, %v186_v40  ;;  %v253_v15 = vshrl.u32 %v570_v32, %v250_v4  ;;  %v256_v18 = vshrl.u32 %v571_v34, %v250_v4  ;;  %v258_v19 = vshll.u32 %v571_v34, %v249_v28 }
  0x34   :  { %v693_v8 = vsub.s32 %v87_v44, %v90_v62  ;;  %v259_v20 = vshrl.u32 %v572_v36, %v250_v4  ;;  %v261_v22 = vshll.u32 %v572_v36, %v249_v28  ;;  %v707_v23 = vshll.u32 %v243_v6, 8 }
  0x35   :  { %v192_v21 = vadd.s32 536870912, %v191_v27  ;;  %v343_v29 = vshrl.u32 %v342_v7, 23  ;;  %v83_v31 = vadd.s32 %v644_v14, %v641_v13  ;;  %v262_v35 = vshrl.u32 %v573_v38, %v250_v4 }
  0x36   :  { %v93_v17 = vsub.s32 0, %v693_v8  ;;  %vm270_vm13 = vcmp.lt.s32.totalorder %v696_v10, 4  ;;  %v251_v26 = vshrl.u32 %v569_v30, %v250_v4  ;;  %v264_v39 = vshll.u32 %v573_v38, %v249_v28 }
  0x37   :  { %v714_v37 = vshrl.u32 %v192_v21, 30  ;;  %v265_v25 = vshrl.u32 %v574_v46, %v250_v4  ;;  %v254_v42 = vor.u32 %v253_v15, %v252_v12  ;;  %v257_v43 = vor.u32 %v256_v18, %v255_v16 }
  0x38   :  { %v465_v33 = vmin.u32 %v93_v17, %v693_v8  ;;  %v260_v13 = vor.u32 %v259_v20, %v258_v19  ;;  %v263_v44 = vor.u32 %v262_v35, %v261_v22  ;;  %vm267_vm15 = vcmp.lt.s32.totalorder %v696_v10, 1 }
  0x39   :  { %v194_v14 = vshll.u32 %v714_v37, 30  ;;  %vm269_vm0 = vcmp.lt.s32.totalorder %v696_v10, 3  ;;  %v266_v47 = vor.u32 %v265_v25, %v264_v39  ;;  %v476_v49 = vadd.s32 4294967169, %v343_v29 }
  0x3a   :  { %v95_v41 = vclz %v465_v33  ;;  %v272_v48 = vsel %vm270_vm13, %v260_v13, 2102212464  ;;  %v113_v50 = vsub.s32 4, %v685_v61  ;;  %vm268_vm1 = vcmp.lt.s32.totalorder %v696_v10, 2 }
  0x3b   :  { %v726_v51 = vsub.s32 %v191_v27, %v194_v14  ;;  %v276_v52 = vsel %vm270_vm13, %v263_v44, 920167782  ;;  %v271_v53 = vsel %vm267_vm15, %v251_v26, %v254_v42  ;;  %v275_v54 = vsel %vm267_vm15, %v254_v42, %v257_v43 }
  0x3c   :  { %v466_v45 = vadd.s32 4294967294, %v95_v41  ;;  %v277_v56 = vsel %vm269_vm0, %v260_v13, %v276_v52  ;;  %v273_v28 = vsel %vm269_vm0, %v257_v43, %v272_v48  ;;  %v279_v40 = vsel %vm267_vm15, %v257_v43, %v260_v13 }
  0x3d   :  { %v197_v59 = vsub.s32 0, %v726_v51  ;;  %v280_v6 = vsel %vm270_vm13, %v266_v47, 1326507024  ;;  %v278_v9 = vsel %vm268_vm1, %v275_v54, %v277_v56  ;;  %v752_v12 = vand.u32 8388607, %v339_v11 }
  0x3e   :  { %vm467_vm2 = vcmp.lt.s32.totalorder %v466_v45, 0  ;;  %v281_v27 = vsel %vm269_vm0, %v263_v44, %v280_v6  ;;  %v349_v17 = vadd.s32 1, %v476_v49  ;;  %vm758_vm3 = vcmp.le.f32.partialorder %v27_v3, 0.7853982 }
  0x3f   :  { %v98_v57 = vsel %vm467_vm2, 0, %v466_v45  ;;  %v469_v7 = vmin.u32 %v197_v59, %v726_v51  ;;  %v114_v19 = vsel %vm29_vm14, %v113_v50, %v685_v61  ;;  %v274_v21 = vsel %vm268_vm1, %v271_v53, %v273_v28 }
  0x40   :  { %v99_v62 = vsub.s32 32, %v98_v57  ;;  %v100_v63 = vshll.u32 %v693_v8, %v98_v57  ;;  %v103_v4 = vsub.s32 4294967266, %v98_v57  ;;  %v282_v8 = vsel %vm268_vm1, %v279_v40, %v281_v27 }
  0x41   :  { %v199_v20 = vclz %v469_v7  ;;  %v772_v3 = vmul.u32.u64.low %v707_v23, %v278_v9  ;;  %v773_v26 = vmul.u32.u64.high %v707_v23, %v278_v9, %v772_v3  ;;  %vm350_vm4 = vcmp.gt.s32.totalorder %v349_v17, 0 }
  0x42   :  { %v101_v15 = vshrl.u32 %v83_v31, %v99_v62  ;;  %v104_v16 = vadd.s32 127, %v103_v4  ;;  %v768_v31 = vmul.u32.u64.low %v707_v23, %v282_v8  ;;  %v769_v33 = vmul.u32.u64.high %v707_v23, %v282_v8, %v768_v31 }
  0x43   :  { %v470_v35 = vadd.s32 4294967294, %v199_v20  ;;  %v347_v61 = vor.u32 8388608, %v752_v12  ;;  %v351_v41 = vsel %vm350_vm4, %v349_v17, 0  ;;  %v116_v10 = vsel %vm758_vm3, 0, %v114_v19 }
  0x44   :  { %v102_v22 = vor.u32 %v101_v15, %v100_v63  ;;  %v105_v29 = vshll.u32 %v104_v16, 23  ;;  %v187_v42 = vadd.s32 %v673_v55, %v679_v58  ;;  %v353_v43 = vand.u32 31, %v351_v41 }
  0x45   :  { %vm471_vm5 = vcmp.lt.s32.totalorder %v470_v35, 0  ;;  %v290_v44 = vmul.u32 %v707_v23, %v274_v21  ;;  %vm292_vm6 = vc.u32 %v769_v33, %v772_v3  ;;  %v293_v49 = vadd.s32 1, %v773_v26 }
  0x46   :  { %v106_v39 = vor.u32 4788187, %v105_v29  ;;  %v109_v25 = vcvt.s32.f32 %v102_v22  ;;  %v202_v14 = vsel %vm471_vm5, 0, %v470_v35  ;;  %v120_v52 = vadd.s32 3, %v116_v10 }
  0x47   :  { %v203_v45 = vsub.s32 32, %v202_v14  ;;  %v204_v47 = vshll.u32 %v726_v51, %v202_v14  ;;  %v207_v48 = vsub.s32 4294967266, %v202_v14  ;;  %v786_v53 = vshrl.u32 %v351_v41, 5 }
  0x48   :  { %v107_v13 = vand.u32 2147483647, %v106_v39  ;;  %v354_v55 = vsub.s32 32, %v353_v43  ;;  %v294_v56 = vsel %vm292_vm6, %v293_v49, %v773_v26  ;;  %v356_v23 = vshll.u32 %v569_v30, %v353_v43 }
  0x49   :  { %v205_v58 = vshrl.u32 %v187_v42, %v203_v45  ;;  %v208_v54 = vadd.s32 127, %v207_v48  ;;  %vm133_vm7 = vcmp.lt.s32.totalorder %v594_v1, 0  ;;  %v295_v59 = vadd.s32 %v294_v56, %v290_v44 }
  0x4a   :  { %v110_v50 = vmul.f32 %v109_v25, %v107_v13  ;;  %v357_v51 = vshrl.u32 %v570_v32, %v354_v55  ;;  %v359_v28 = vshll.u32 %v570_v32, %v353_v43  ;;  %vm795_vm8 = vcmp.le.f32.partialorder %v131_v5, 0.7853982 }
  0x4b   :  { %v206_v62 = vor.u32 %v205_v58, %v204_v47  ;;  %v209_v63 = vshll.u32 %v208_v54, 23  ;;  %v360_v4 = vshrl.u32 %v571_v34, %v354_v55  ;;  %v362_v6 = vshll.u32 %v571_v34, %v353_v43 }
  0x4c   :  { %v111_v57 = vxor.u32 2147483648, %v110_v50  ;;  %v296_v9 = vadd.s32 536870912, %v295_v59  ;;  %v363_v27 = vshrl.u32 %v572_v36, %v354_v55  ;;  %v365_v32 = vshll.u32 %v572_v36, %v353_v43 }
  0x4d   :  { %v210_v12 = vor.u32 4788187, %v209_v63  ;;  %v213_v15 = vcvt.s32.f32 %v206_v62  ;;  %v358_v16 = vor.u32 %v357_v51, %v356_v23  ;;  %v361_v17 = vor.u32 %v360_v4, %v359_v28 }
  0x4e   :  { %v112_v7 = vsel %vm29_vm14, %v111_v57, %v110_v50  ;;  %v808_v8 = vshrl.u32 %v296_v9, 30  ;;  %v366_v34 = vshrl.u32 %v573_v38, %v354_v55  ;;  %v368_v20 = vshll.u32 %v573_v38, %v353_v43 }
  0x4f   :  { %v115_v5 = vsel %vm758_vm3, %v592_v0, %v112_v7  ;;  %v211_v19 = vand.u32 2147483647, %v210_v12  ;;  %v369_v21 = vshrl.u32 %v574_v46, %v354_v55  ;;  %v217_v36 = vsub.s32 4, %v714_v37 }
  0x50   :  { %506 = vcosq.f32 %v115_v5  ;;  %v298_v18 = vshll.u32 %v808_v8, 30  ;;  %v367_v22 = vor.u32 %v366_v34, %v365_v32  ;;  %vm371_vm9 = vcmp.lt.s32.totalorder %v786_v53, 1 }
  0x51   :  { %508 = vsinq.f32 %v115_v5  ;;  %v214_v29 = vmul.f32 %v213_v15, %v211_v19  ;;  %v355_v31 = vshrl.u32 %v569_v30, %v354_v55  ;;  %v364_v35 = vor.u32 %v363_v27, %v362_v6 }
  0x52   :  { %v387_v26 = vshll.u32 %v347_v61, 8  ;;  %v299_v39 = vsub.s32 %v295_v59, %v298_v18  ;;  %v370_v25 = vor.u32 %v369_v21, %v368_v20  ;;  %vm373_vm10 = vcmp.lt.s32.totalorder %v786_v53, 3 }
  0x53   :  { %vm374_vm11 = vcmp.lt.s32.totalorder %v786_v53, 4  ;;  %v215_v38 = vxor.u32 2147483648, %v214_v29  ;;  %vm372_vm12 = vcmp.lt.s32.totalorder %v786_v53, 2  ;;  %v379_v41 = vsel %vm371_vm9, %v358_v16, %v361_v17 }
  0x54   :  { %v376_v46 = vsel %vm374_vm11, %v364_v35, 2102212464  ;;  %v121_v10 = vand.u32 3, %v120_v52  ;;  %v218_v30 = vsel %vm133_vm7, %v217_v36, %v714_v37  ;;  %v301_v61 = vsub.s32 0, %v299_v39 }
  0x55   :  { %v380_v42 = vsel %vm374_vm11, %v367_v22, 920167782  ;;  %v216_v43 = vsel %vm133_vm7, %v215_v38, %v214_v29  ;;  %v375_v13 = vsel %vm371_vm9, %v355_v31, %v358_v16  ;;  %v377_v14 = vsel %vm373_vm10, %v361_v17, %v376_v46 }
  0x56   :  { %v381_v44 = vsel %vm373_vm10, %v364_v35, %v380_v42  ;;  %v219_v37 = vsel %vm795_vm8, %v594_v1, %v216_v43  ;;  %v473_v45 = vmin.u32 %v301_v61, %v299_v39  ;;  %v383_v48 = vsel %vm371_vm9, %v361_v17, %v364_v35 }
  0x57   :  { %v382_v47 = vsel %vm372_vm12, %v379_v41, %v381_v44  ;;  %510 = vcosq.f32 %v219_v37  ;;  %v384_v49 = vsel %vm374_vm11, %v370_v25, 1326507024  ;;  %v220_v55 = vsel %vm795_vm8, 0, %v218_v30 }
  0x58   :  { %v846_v50 = vmul.u32.u64.low %v387_v26, %v382_v47  ;;  %v847_v52 = vmul.u32.u64.high %v387_v26, %v382_v47, %v846_v50  ;;  %512 = vsinq.f32 %v219_v37  ;;  %v303_v58 = vclz %v473_v45 }
  0x59   :  { %vm119_vm13 = vweird.f32 %v592_v0  ;;  %v385_v54 = vsel %vm373_vm10, %v367_v22, %v384_v49  ;;  %vm123_vm14 = vcmp.eq.s32.totalorder %v121_v10, 0  ;;  %v378_v23 = vsel %vm372_vm12, %v375_v13, %v377_v14 }
  0x5a   :  { %v474_v56 = vadd.s32 4294967294, %v303_v58  ;;  %v386_v57 = vsel %vm372_vm12, %v383_v48, %v385_v54  ;;  %vm126_vm15 = vcmp.eq.s32.totalorder %v121_v10, 2  ;;  %v224_v51 = vadd.s32 3, %v220_v55 }
  0x5b   :  { %v859_v28 = vmul.u32.u64.low %v387_v26, %v386_v57  ;;  %v860_v40 = vmul.u32.u64.high %v387_v26, %v386_v57, %v859_v28  ;;  %v291_v4 = vadd.s32 %v772_v3, %v769_v33  ;;  %v397_v6 = vadd.s32 1, %v847_v52 }
  0x5c   :  { %vm475_vm0 = vcmp.lt.s32.totalorder %v474_v56, 0  ;;  %vm122_vm1 = vcmp.lt.s32.totalorder %v121_v10, 2  ;;  %v394_v27 = vmul.u32 %v387_v26, %v378_v23  ;;  %v225_v16 = vand.u32 3, %v224_v51 }
  0x5d   :  { %v507_v59 = vpop.eup %506  ;;  %v306_v9 = vsel %vm475_vm0, 0, %v474_v56  ;;  %vm396_vm2 = vc.u32 %v860_v40, %v846_v50  ;;  %vm223_vm6 = vweird.f32 %v594_v1  ;;  %vm237_vm7 = vcmp.lt.s32.totalorder %v596_v2, 0 }
  0x5e   :  { %v509_v62 = vpop.eup %508  ;;  %v127_v63 = vxor.u32 2147483648, %v507_v59  ;;  %v307_v32 = vsub.s32 32, %v306_v9  ;;  %v308_v5 = vshll.u32 %v299_v39, %v306_v9  ;;  %v311_v12 = vsub.s32 4294967266, %v306_v9 }
  0x5f   :  { %v124_v7 = vxor.u32 2147483648, %v509_v62  ;;  %v398_v3 = vsel %vm396_vm2, %v397_v6, %v847_v52  ;;  %vm230_vm3 = vcmp.eq.s32.totalorder %v225_v16, 2  ;;  %vm227_vm4 = vcmp.eq.s32.totalorder %v225_v16, 0 }
  0x60   :  { %v128_v53 = vsel %vm126_vm15, %v127_v63, %v509_v62  ;;  %v309_v34 = vshrl.u32 %v291_v4, %v307_v32  ;;  %v312_v33 = vadd.s32 127, %v311_v12  ;;  %v399_v20 = vadd.s32 %v398_v3, %v394_v27 }
  0x61   :  { %v125_v15 = vsel %vm123_vm14, %v507_v59, %v124_v7  ;;  %vm226_vm5 = vcmp.lt.s32.totalorder %v225_v16, 2  ;;  %v321_v61 = vsub.s32 4, %v808_v8  ;;  %vm236_vm8 = vcmp.le.f32.partialorder %v235_v24, 0.7853982 }
  0x62   :  { %v129_v17 = vsel %vm122_vm1, %v125_v15, %v128_v53  ;;  %v310_v21 = vor.u32 %v309_v34, %v308_v5  ;;  %v313_v36 = vshll.u32 %v312_v33, 23  ;;  %v400_v18 = vadd.s32 536870912, %v399_v20 }
  0x63   :  { %v130_v19 = vsel %vm119_vm13, nan, %v129_v17  ;;  %v322_v1 = vsel %vm237_vm7, %v321_v61, %v808_v8  ;;  %v395_v55 = vadd.s32 %v846_v50, %v860_v40  ;;  %vm327_vm13 = vweird.f32 %v596_v2 }
  0x64   :  { %443 = vst [vmem:[#allocation5] sm:$0xff] %v130_v19  ;;  %v511_v22 = vpop.eup %510  ;;  %v314_v29 = vor.u32 4788187, %v313_v36  ;;  %v317_v31 = vcvt.s32.f32 %v310_v21  ;;  %v401_v39 = vshrl.u32 %v400_v18, 30  ;;  %v324_v48 = vsel %vm236_vm8, 0, %v322_v1 }
  0x65   :  { %v513_v35 = vpop.eup %512  ;;  %v231_v26 = vxor.u32 2147483648, %v511_v22  ;;  %v328_v52 = vadd.s32 3, %v324_v48  ;;  %vm341_vm14 = vcmp.lt.s32.totalorder %v683_v60, 0  ;;  %vm340_vm15 = vcmp.le.f32.partialorder %v339_v11, 0.7853982 }
  0x66   :  { %v228_v25 = vxor.u32 2147483648, %v513_v35  ;;  %v315_v38 = vand.u32 2147483647, %v314_v29  ;;  %v402_v46 = vshll.u32 %v401_v39, 30  ;;  %v425_v32 = vsub.s32 4, %v401_v39 }
  0x67   :  { %v232_v0 = vsel %vm230_vm3, %v231_v26, %v513_v35  ;;  %v329_v23 = vand.u32 3, %v328_v52  ;;  %vm431_vm3 = vweird.f32 %v683_v60 }
  0x68   :  { %v229_v41 = vsel %vm227_vm4, %v511_v22, %v228_v25  ;;  %v318_v10 = vmul.f32 %v317_v31, %v315_v38  ;;  %v403_v42 = vsub.s32 %v399_v20, %v402_v46  ;;  %v426_v16 = vsel %vm341_vm14, %v425_v32, %v401_v39 }
  0x69   :  { %v233_v30 = vsel %vm226_vm5, %v229_v41, %v232_v0  ;;  %vm334_vm10 = vcmp.eq.s32.totalorder %v329_v23, 2  ;;  %vm331_vm11 = vcmp.eq.s32.totalorder %v329_v23, 0  ;;  %vm330_vm12 = vcmp.lt.s32.totalorder %v329_v23, 2 }
  0x6a   :  { %v234_v43 = vsel %vm223_vm6, nan, %v233_v30  ;;  %v319_v13 = vxor.u32 2147483648, %v318_v10  ;;  %v405_v14 = vsub.s32 0, %v403_v42 }
  0x6b   :  { %444 = vst [vmem:[#allocation5 + $0x8] sm:$0xff] %v234_v43 }
  0x6c   :  { %v320_v44 = vsel %vm237_vm7, %v319_v13, %v318_v10  ;;  %v477_v45 = vmin.u32 %v405_v14, %v403_v42 }
  0x6d   :  { %v323_v37 = vsel %vm236_vm8, %v596_v2, %v320_v44  ;;  %v428_v2 = vsel %vm340_vm15, 0, %v426_v16 }
  0x6e   :  { %514 = vcosq.f32 %v323_v37  ;;  %v407_v47 = vclz %v477_v45  ;;  %v432_v34 = vadd.s32 3, %v428_v2 }
  0x6f   :  { %516 = vsinq.f32 %v323_v37 }
  0x70   :  { %v478_v49 = vadd.s32 4294967294, %v407_v47  ;;  %v433_v33 = vand.u32 3, %v432_v34 }
  0x72   :  { %vm479_vm9 = vcmp.lt.s32.totalorder %v478_v49, 0  ;;  %vm438_vm0 = vcmp.eq.s32.totalorder %v433_v33, 2  ;;  %vm435_vm1 = vcmp.eq.s32.totalorder %v433_v33, 0  ;;  %vm434_vm2 = vcmp.lt.s32.totalorder %v433_v33, 2 }
  0x73   :  { %v410_v24 = vsel %vm479_vm9, 0, %v478_v49 }
  0x74   :  { %v411_v58 = vsub.s32 32, %v410_v24  ;;  %v412_v54 = vshll.u32 %v403_v42, %v410_v24  ;;  %v415_v56 = vsub.s32 4294967266, %v410_v24 }
  0x76   :  { %v413_v57 = vshrl.u32 %v395_v55, %v411_v58  ;;  %v416_v8 = vadd.s32 127, %v415_v56 }
  0x78   :  { %v414_v59 = vor.u32 %v413_v57, %v412_v54  ;;  %v417_v51 = vshll.u32 %v416_v8, 23 }
  0x7a   :  { %v418_v62 = vor.u32 4788187, %v417_v51  ;;  %v421_v63 = vcvt.s32.f32 %v414_v59 }
  0x7b   :  { %v515_v28 = vpop.eup %514 }
  0x7c   :  { %v517_v4 = vpop.eup %516  ;;  %v335_v6 = vxor.u32 2147483648, %v515_v28  ;;  %v419_v50 = vand.u32 2147483647, %v418_v62 }
  0x7d   :  { %v332_v7 = vxor.u32 2147483648, %v517_v4 }
  0x7e   :  { %v336_v40 = vsel %vm334_vm10, %v335_v6, %v517_v4  ;;  %v422_v27 = vmul.f32 %v421_v63, %v419_v50 }
  0x7f   :  { %v333_v9 = vsel %vm331_vm11, %v515_v28, %v332_v7 }
  0x80   :  { %v337_v53 = vsel %vm330_vm12, %v333_v9, %v336_v40  ;;  %v423_v12 = vxor.u32 2147483648, %v422_v27 }
  0x81   :  { %v338_v5 = vsel %vm327_vm13, nan, %v337_v53 }
  0x82   :  { %445 = vst [vmem:[#allocation5 + $0x10] sm:$0xff] %v338_v5  ;;  %v424_v15 = vsel %vm341_vm14, %v423_v12, %v422_v27 }
  0x83   :  { %v427_v17 = vsel %vm340_vm15, %v683_v60, %v424_v15 }
  0x84   :  { %518 = vcosq.f32 %v427_v17 }
  0x85   :  { %520 = vsinq.f32 %v427_v17 }
  0x91   :  { %v519_v3 = vpop.eup %518 }
  0x92   :  { %v521_v19 = vpop.eup %520  ;;  %v439_v20 = vxor.u32 2147483648, %v519_v3 }
  0x93   :  { %v436_v21 = vxor.u32 2147483648, %v521_v19 }
  0x94   :  { %v440_v11 = vsel %vm438_vm0, %v439_v20, %v521_v19 }
  0x95   :  { %v437_v36 = vsel %vm435_vm1, %v519_v3, %v436_v21 }
  0x96   :  { %v441_v18 = vsel %vm434_vm2, %v437_v36, %v440_v11 }
  0x97   :  { %v442_v22 = vsel %vm431_vm3, nan, %v441_v18 }
  0x98   :  { %446 = vst [vmem:[#allocation5 + $0x18] sm:$0xff] %v442_v22 }
  0x99   :  { %553 = shalt.err (!%p550_p9)
}
  0x9a   :  { %458 = dma.vmem_to_hbm [thread:$0]  %s453_s13, 512, %s893_s1, [#allocation4], %s567_s9, %s567_s9, %s568_s10  }
  0x9b   :  { %564 = dma.done.wait [#allocation4], 512  }
  0x9c   :  { %565 = vsyncadd [#allocation4], 4294966784 }
  0x9d   :  { %462 = vsyncpa [#allocation3], 1 }
  0x9e   :  { %463 = vsyncpa [#allocation4], 1 }

</bundles_post_ra>
